<compile_context>
chip_gen: v7x
topology: tpu7x:2x2x1
jax: 0.10.0
libtpu: 0.0.40
codegen_flags: <defaults>
</compile_context>

<pallas_src>
import jax
import jax.numpy as jnp
from jax.experimental import pallas as pl
from jax.experimental.pallas import tpu as pltpu

LANE = 128


def _round_up(x, m):
    return (x + m - 1) // m * m


# ----------------------------- Pallas kernel --------------------------------
def combined_gcn_kernel(a_pair_ref, x_ref, w1_ref, b1_ref, w2_ref, b2_ref,
                        wfc_ref, bfc_ref, wo_ref, bo_ref, out_ref):
    """One grid step == one graph of the mini-batch.

    a_pair_ref : (2, N, N)  [A0_norm, I]; resident in VMEM across all steps
    x_ref      : (1, N, F)  this graph's node features        (MXU dtype)
    w*_ref     : (in, out)  Linear-style weights (MXU dtype); b*_ref (1, out) f32
    out_ref    : (1, 1, A_pad) f32 lane-padded q-values row for this graph
    """
    mxu_dtype = w1_ref.dtype
    b = pl.program_id(0)
    # graph 0 uses the real normalized adjacency block; all others use identity
    # (blockdiag structure implied by the original module's un-offset edge_index).
    a = jnp.where(b == 0, a_pair_ref[0], a_pair_ref[1])     # (N, N)
    x = x_ref[0]                                             # (N, F)

    # GCN layer 1: relu(A @ (X @ W1) + b1)  -- bf16 MXU inputs, f32 accumulation
    h = jnp.dot(x, w1_ref[...], preferred_element_type=jnp.float32)
    h = jnp.dot(a, h.astype(mxu_dtype), preferred_element_type=jnp.float32)
    h = jnp.maximum(h + b1_ref[...], 0.0)

    # GCN layer 2: relu(A @ (H1 @ W2) + b2)
    h = jnp.dot(h.astype(mxu_dtype), w2_ref[...], preferred_element_type=jnp.float32)
    h = jnp.dot(a, h.astype(mxu_dtype), preferred_element_type=jnp.float32)
    h = jnp.maximum(h + b2_ref[...], 0.0)

    # global mean pool over this graph's nodes: cheap sublane (XLU) reduction
    pooled = jnp.mean(h, axis=0, keepdims=True)              # (1, E) f32

    # fc + relu
    h = jnp.dot(pooled.astype(mxu_dtype), wfc_ref[...],
                preferred_element_type=jnp.float32)
    h = jnp.maximum(h + bfc_ref[...], 0.0)

    # output layer (lane-padded to 128 so the store is a full, unmasked vst)
    q = jnp.dot(h.astype(mxu_dtype), wo_ref[...],
                preferred_element_type=jnp.float32) + bo_ref[...]
    out_ref[0] = q                                           # (1, A_pad)


def run_combined_gcn_pallas(a_pair, x_nodes, params, num_actions,
                            *, compute_dtype=jnp.bfloat16):
    """a_pair: (2, N, N) f32 [A0_norm, I]; x_nodes: (B, N, F) f32 -> (B, A) f32."""
    batch_size, num_nodes, num_features = x_nodes.shape
    (w1, b1, w2, b2, wfc, bfc, wo, bo) = params
    hidden = w1.shape[1]
    embed = w2.shape[1]

    # lane-pad the output head so the kernel writes a 128-lane-dense block
    a_pad = _round_up(max(num_actions, 1), LANE)
    wo_p = jnp.zeros((embed, a_pad), jnp.float32).at[:, :num_actions].set(wo)
    bo_p = jnp.zeros((1, a_pad), jnp.float32).at[:, :num_actions].set(bo)

    # cast MXU operands only; biases (and all elementwise math) stay f32
    cast = lambda t: t.astype(compute_dtype)
    a_c, x_c = cast(a_pair), cast(x_nodes)
    w1_c, w2_c, wfc_c, wo_c = cast(w1), cast(w2), cast(wfc), cast(wo_p)
    b1_c = b1.astype(jnp.float32)
    b2_c = b2.astype(jnp.float32)
    bfc_c = bfc.astype(jnp.float32)
    bo_c = bo_p

    def full_spec(shape):
        # whole (small) parameter array resident in VMEM, same block every step
        return pl.BlockSpec(shape, lambda b, _n=len(shape): (0,) * _n)

    out = pl.pallas_call(
        combined_gcn_kernel,
        out_shape=jax.ShapeDtypeStruct((batch_size, 1, a_pad), jnp.float32),
        grid=(batch_size,),
        in_specs=[
            full_spec((2, num_nodes, num_nodes)),               # [A0_norm, I]
            pl.BlockSpec((1, num_nodes, num_features), lambda b: (b, 0, 0)),  # X block
            full_spec((num_features, hidden)),   # w1
            full_spec((1, hidden)),              # b1
            full_spec((hidden, embed)),          # w2
            full_spec((1, embed)),               # b2
            full_spec((embed, embed)),           # wfc
            full_spec((1, embed)),               # bfc
            full_spec((embed, a_pad)),           # wo (lane padded)
            full_spec((1, a_pad)),               # bo (lane padded)
        ],
        out_specs=pl.BlockSpec((1, 1, a_pad), lambda b: (b, 0, 0)),
        compiler_params=pltpu.CompilerParams(
            # batch axis is independent -> megacore split on v7x (no-op on v5e/v6e)
            dimension_semantics=("parallel",),
            vmem_limit_bytes=32 * 1024 * 1024,
        ),
    )(a_c, x_c, w1_c, b1_c, w2_c, b2_c, wfc_c, bfc_c, wo_c, bo_c)

    return out[:, 0, :num_actions]


# ------------------------------- JAX glue ------------------------------------
def build_adjacency_pair(edge_index_flat, num_nodes):
    """[A0_norm, I] pair reproducing the original module's gcn_norm semantics.

    The original forward does `edge_index.view(2, -1)` WITHOUT per-graph node
    offsets, so every (src, dst) is a per-graph node id in [0, num_nodes).
    The dense (B*N, B*N) gcn_norm matrix it implies is blockdiag(A0_norm, I,...):
    all edges land in the leading N x N block; every other node only gets its
    remaining-self-loop (degree 1) -> identity after normalization.
    """
    src = edge_index_flat[0]
    dst = edge_index_flat[1]
    a0 = jnp.zeros((num_nodes, num_nodes), jnp.float32).at[dst, src].add(1.0)
    # add_remaining_self_loops: only add a self loop where none exists
    diag = jnp.diagonal(a0)
    a0 = a0 + jnp.diag(jnp.where(diag == 0.0, 1.0, 0.0))
    deg = jnp.sum(a0, axis=1)
    dinv = jnp.where(deg > 0.0, 1.0 / jnp.sqrt(deg), 0.0)
    a0 = dinv[:, None] * a0 * dinv[None, :]          # D^-1/2 (A + I') D^-1/2
    eye = jnp.eye(num_nodes, dtype=jnp.float32)
    return jnp.stack([a0, eye], axis=0)               # (2, N, N)


def combined_gcn_forward(node_features, edge_index, params, num_actions,
                         *, compute_dtype=jnp.bfloat16):
    """node_features: (B, N, F) f32; edge_index: (B, 2, E) int32."""
    batch_size, num_nodes, _ = node_features.shape
    ei = edge_index.reshape(2, -1).astype(jnp.int32)   # same view(2, -1) as torch

    if ei.shape[1] == 0:
        # torch.zeros(x.size(0), out_features) -- x is the flattened (B*N, F) tensor
        return jnp.zeros((batch_size * num_nodes, num_actions), dtype=jnp.float32)

    a_pair = build_adjacency_pair(ei, num_nodes)
    return run_combined_gcn_pallas(a_pair, node_features, params, num_actions,
                                   compute_dtype=compute_dtype)


def init_params(key, num_features, embed_dim, num_actions):
    """Deterministic synthetic params (torch Linear-style, stored as (in, out))."""
    ks = jax.random.split(key, 8)
    scale = 0.1

    def lin(k_w, in_dim, out_dim):
        return scale * jax.random.normal(k_w, (in_dim, out_dim), dtype=jnp.float32)

    w1 = lin(ks[0], num_features, 128)
    b1 = scale * jax.random.normal(ks[1], (1, 128), dtype=jnp.float32)
    w2 = lin(ks[2], 128, embed_dim)
    b2 = scale * jax.random.normal(ks[3], (1, embed_dim), dtype=jnp.float32)
    wfc = lin(ks[4], embed_dim, embed_dim)
    bfc = scale * jax.random.normal(ks[5], (1, embed_dim), dtype=jnp.float32)
    wo = lin(ks[6], embed_dim, num_actions)
    bo = scale * jax.random.normal(ks[7], (1, num_actions), dtype=jnp.float32)
    return (w1, b1, w2, b2, wfc, bfc, wo, bo)


# ----------------------------- reference checks -------------------------------
def _dense_gcn_norm(edge_index_flat, num_total_nodes):
    """Original-module semantics: dense (B*N, B*N) gcn_norm adjacency."""
    src, dst = edge_index_flat[0], edge_index_flat[1]
    a = jnp.zeros((num_total_nodes, num_total_nodes), jnp.float32).at[dst, src].add(1.0)
    diag = jnp.diagonal(a)
    a = a + jnp.diag(jnp.where(diag == 0.0, 1.0, 0.0))
    deg = jnp.sum(a, axis=1)
    dinv = jnp.where(deg > 0.0, 1.0 / jnp.sqrt(deg), 0.0)
    return dinv[:, None] * a * dinv[None, :]


def reference_forward_f32(node_features, edge_index, params):
    """Pure f32, dense-A reference with the exact original-module formulation."""
    (w1, b1, w2, b2, wfc, bfc, wo, bo) = params
    batch_size, num_nodes, num_features = node_features.shape
    x = node_features.reshape(-1, num_features)
    ei = edge_index.reshape(2, -1).astype(jnp.int32)
    a = _dense_gcn_norm(ei, batch_size * num_nodes)
    h = jnp.maximum(a @ (x @ w1) + b1, 0.0)
    h = jnp.maximum(a @ (h @ w2) + b2, 0.0)
    h = h.reshape(batch_size, num_nodes, -1).mean(axis=1)
    h = jnp.maximum(h @ wfc + bfc, 0.0)
    return h @ wo + bo


def reference_forward_mixed(node_features, edge_index, params, compute_dtype=jnp.bfloat16):
    """Plain-JAX mirror of the kernel's block-structured mixed-precision math."""
    (w1, b1, w2, b2, wfc, bfc, wo, bo) = params
    batch_size, num_nodes, _ = node_features.shape
    ei = edge_index.reshape(2, -1).astype(jnp.int32)
    c = compute_dtype
    pair = build_adjacency_pair(ei, num_nodes).astype(c)
    block_sel = jnp.minimum(jnp.arange(batch_size), 1)
    a = pair[block_sel]                                   # (B, N, N) blockdiag pieces
    x = node_features.astype(c)

    def dot(eq, lhs, rhs):
        return jnp.einsum(eq, lhs, rhs, preferred_element_type=jnp.float32)

    h = dot('bnf,fh->bnh', x, w1.astype(c))
    h = jnp.maximum(dot('bij,bjh->bih', a, h.astype(c)) + b1, 0.0)
    h = dot('bnh,he->bne', h.astype(c), w2.astype(c))
    h = jnp.maximum(dot('bij,bje->bie', a, h.astype(c)) + b2, 0.0)
    pooled = h.mean(axis=1)
    h = jnp.maximum(dot('be,ef->bf', pooled.astype(c), wfc.astype(c)) + bfc, 0.0)
    return dot('bf,fa->ba', h.astype(c), wo.astype(c)) + bo


if __name__ == "__main__":
    key = jax.random.PRNGKey(0)
    k_x, k_e, k_p = jax.random.split(key, 3)

    batch_size, num_nodes, num_features = 2, 16, 4
    num_edges = 8
    embed_dim = 64
    num_actions = 8

    node_features = jax.random.normal(
        k_x, (batch_size, num_nodes, num_features), dtype=jnp.float32)
    # random edges; avoid self-loops so add_remaining_self_loops semantics are unambiguous
    k_src, k_dst = jax.random.split(k_e)
    src = jax.random.randint(k_src, (batch_size, 1, num_edges), 0, num_nodes)
    off = jax.random.randint(k_dst, (batch_size, 1, num_edges), 1, num_nodes)
    dst = (src + off) % num_nodes
    edge_index = jnp.concatenate([src, dst], axis=1).astype(jnp.int32)  # (B, 2, E)

    params = init_params(k_p, num_features, embed_dim, num_actions)

    q = combined_gcn_forward(node_features, edge_index, params, num_actions)
    q = jax.block_until_ready(q)
    assert q.shape == (batch_size, num_actions)

    # tight check vs a plain-JAX mirror of the same mixed-precision block math
    q_mixed = reference_forward_mixed(node_features, edge_index, params)
    assert jnp.allclose(q, q_mixed, atol=1e-2, rtol=1e-2), (q, q_mixed)

    # semantic check vs the exact original-module dense f32 formulation
    # (loose tolerance only accounts for bf16 MXU inputs)
    q_f32 = reference_forward_f32(node_features, edge_index, params)
    assert jnp.allclose(q, q_f32, atol=5e-2, rtol=5e-2), (q, q_f32)

    print("KERNEL_OK")
</pallas_src>

<mosaic_0001>
module attributes {stable_mosaic.version = 11 : i64} {
  func.func @combined_gcn_kernel(%arg0: i32, %arg1: memref<2x16x16xbf16, #tpu.memory_space<vmem>>, %arg2: memref<1x16x4xbf16, #tpu.memory_space<vmem>>, %arg3: memref<4x128xbf16, #tpu.memory_space<vmem>>, %arg4: memref<1x128xf32, #tpu.memory_space<vmem>>, %arg5: memref<128x64xbf16, #tpu.memory_space<vmem>>, %arg6: memref<1x64xf32, #tpu.memory_space<vmem>>, %arg7: memref<64x64xbf16, #tpu.memory_space<vmem>>, %arg8: memref<1x64xf32, #tpu.memory_space<vmem>>, %arg9: memref<64x128xbf16, #tpu.memory_space<vmem>>, %arg10: memref<1x128xf32, #tpu.memory_space<vmem>>, %arg11: memref<1x1x128xf32, #tpu.memory_space<vmem>>) attributes {dimension_semantics = [#tpu.dimension_semantics<parallel>], iteration_bounds = array<i64: 2>, scalar_prefetch = 0 : i64, scratch_operands = 0 : i64, tpu.core_type = #tpu.core_type<tc>, window_params = [{pipeline_mode = #tpu.pipeline_mode<synchronous>, transform_indices = @transform_0, window_bounds = array<i64: 2, 16, 16>}, {transform_indices = @transform_1, window_bounds = array<i64: 1, 16, 4>}, {pipeline_mode = #tpu.pipeline_mode<synchronous>, transform_indices = @transform_2, window_bounds = array<i64: 4, 128>}, {pipeline_mode = #tpu.pipeline_mode<synchronous>, transform_indices = @transform_3, window_bounds = array<i64: 1, 128>}, {pipeline_mode = #tpu.pipeline_mode<synchronous>, transform_indices = @transform_4, window_bounds = array<i64: 128, 64>}, {pipeline_mode = #tpu.pipeline_mode<synchronous>, transform_indices = @transform_5, window_bounds = array<i64: 1, 64>}, {pipeline_mode = #tpu.pipeline_mode<synchronous>, transform_indices = @transform_6, window_bounds = array<i64: 64, 64>}, {pipeline_mode = #tpu.pipeline_mode<synchronous>, transform_indices = @transform_7, window_bounds = array<i64: 1, 64>}, {pipeline_mode = #tpu.pipeline_mode<synchronous>, transform_indices = @transform_8, window_bounds = array<i64: 64, 128>}, {pipeline_mode = #tpu.pipeline_mode<synchronous>, transform_indices = @transform_9, window_bounds = array<i64: 1, 128>}, {transform_indices = @transform_10, window_bounds = array<i64: 1, 1, 128>}]} {
    %c0_i32 = arith.constant 0 : i32
    %0 = arith.cmpi eq, %arg0, %c0_i32 : i32
    %c0 = arith.constant 0 : index
    %c0_0 = arith.constant 0 : index
    %c0_1 = arith.constant 0 : index
    %1 = vector.load %arg1[%c0, %c0_0, %c0_1] : memref<2x16x16xbf16, #tpu.memory_space<vmem>>, vector<1x16x16xbf16>
    %2 = vector.shape_cast %1 : vector<1x16x16xbf16> to vector<16x16xbf16>
    %c1 = arith.constant 1 : index
    %c0_2 = arith.constant 0 : index
    %c0_3 = arith.constant 0 : index
    %3 = vector.load %arg1[%c1, %c0_2, %c0_3] : memref<2x16x16xbf16, #tpu.memory_space<vmem>>, vector<1x16x16xbf16>
    %4 = vector.shape_cast %3 : vector<1x16x16xbf16> to vector<16x16xbf16>
    %5 = arith.select %0, %2, %4 : vector<16x16xbf16>
    %c0_4 = arith.constant 0 : index
    %c0_5 = arith.constant 0 : index
    %c0_6 = arith.constant 0 : index
    %6 = vector.load %arg2[%c0_4, %c0_5, %c0_6] : memref<1x16x4xbf16, #tpu.memory_space<vmem>>, vector<1x16x4xbf16>
    %7 = vector.shape_cast %6 : vector<1x16x4xbf16> to vector<16x4xbf16>
    %c0_7 = arith.constant 0 : index
    %c0_8 = arith.constant 0 : index
    %8 = vector.load %arg3[%c0_7, %c0_8] : memref<4x128xbf16, #tpu.memory_space<vmem>>, vector<4x128xbf16>
    %cst = arith.constant dense<0.000000e+00> : vector<16x128xf32>
    %9 = tpu.matmul %7, %8, %cst {dimension_numbers = #tpu.dot_dimension_numbers<[1], [0], [0], [1], [0, 0, 1, 1], [], []>} : vector<16x4xbf16>, vector<4x128xbf16>, vector<16x128xf32> -> vector<16x128xf32>
    %10 = arith.truncf %9 : vector<16x128xf32> to vector<16x128xbf16>
    %cst_9 = arith.constant dense<0.000000e+00> : vector<16x128xf32>
    %11 = tpu.matmul %5, %10, %cst_9 {dimension_numbers = #tpu.dot_dimension_numbers<[1], [0], [0], [1], [0, 0, 1, 1], [], []>} : vector<16x16xbf16>, vector<16x128xbf16>, vector<16x128xf32> -> vector<16x128xf32>
    %c0_10 = arith.constant 0 : index
    %c0_11 = arith.constant 0 : index
    %12 = vector.load %arg4[%c0_10, %c0_11] : memref<1x128xf32, #tpu.memory_space<vmem>>, vector<1x128xf32>
    %13 = vector.broadcast %12 : vector<1x128xf32> to vector<16x128xf32>
    %14 = arith.addf %11, %13 : vector<16x128xf32>
    %cst_12 = arith.constant 0.000000e+00 : f32
    %15 = vector.broadcast %cst_12 : f32 to vector<16x128xf32>
    %16 = arith.maximumf %14, %15 : vector<16x128xf32>
    %17 = arith.truncf %16 : vector<16x128xf32> to vector<16x128xbf16>
    %c0_13 = arith.constant 0 : index
    %c0_14 = arith.constant 0 : index
    %18 = vector.load %arg5[%c0_13, %c0_14] : memref<128x64xbf16, #tpu.memory_space<vmem>>, vector<128x64xbf16>
    %cst_15 = arith.constant dense<0.000000e+00> : vector<16x64xf32>
    %19 = tpu.matmul %17, %18, %cst_15 {dimension_numbers = #tpu.dot_dimension_numbers<[1], [0], [0], [1], [0, 0, 1, 1], [], []>} : vector<16x128xbf16>, vector<128x64xbf16>, vector<16x64xf32> -> vector<16x64xf32>
    %20 = arith.truncf %19 : vector<16x64xf32> to vector<16x64xbf16>
    %cst_16 = arith.constant dense<0.000000e+00> : vector<16x64xf32>
    %21 = tpu.matmul %5, %20, %cst_16 {dimension_numbers = #tpu.dot_dimension_numbers<[1], [0], [0], [1], [0, 0, 1, 1], [], []>} : vector<16x16xbf16>, vector<16x64xbf16>, vector<16x64xf32> -> vector<16x64xf32>
    %c0_17 = arith.constant 0 : index
    %c0_18 = arith.constant 0 : index
    %22 = vector.load %arg6[%c0_17, %c0_18] : memref<1x64xf32, #tpu.memory_space<vmem>>, vector<1x64xf32>
    %23 = vector.broadcast %22 : vector<1x64xf32> to vector<16x64xf32>
    %24 = arith.addf %21, %23 : vector<16x64xf32>
    %cst_19 = arith.constant 0.000000e+00 : f32
    %25 = vector.broadcast %cst_19 : f32 to vector<16x64xf32>
    %26 = arith.maximumf %24, %25 : vector<16x64xf32>
    %cst_20 = arith.constant dense<0.000000e+00> : vector<64xf32>
    %27 = vector.multi_reduction <add>, %26, %cst_20 [0] : vector<16x64xf32> to vector<64xf32>
    %28 = vector.shape_cast %27 : vector<64xf32> to vector<1x64xf32>
    %cst_21 = arith.constant 1.600000e+01 : f32
    %29 = vector.broadcast %cst_21 : f32 to vector<1x64xf32>
    %30 = arith.divf %28, %29 : vector<1x64xf32>
    %31 = arith.truncf %30 : vector<1x64xf32> to vector<1x64xbf16>
    %c0_22 = arith.constant 0 : index
    %c0_23 = arith.constant 0 : index
    %32 = vector.load %arg7[%c0_22, %c0_23] : memref<64x64xbf16, #tpu.memory_space<vmem>>, vector<64x64xbf16>
    %cst_24 = arith.constant dense<0.000000e+00> : vector<1x64xf32>
    %33 = tpu.matmul %31, %32, %cst_24 {dimension_numbers = #tpu.dot_dimension_numbers<[1], [0], [0], [1], [0, 0, 1, 1], [], []>} : vector<1x64xbf16>, vector<64x64xbf16>, vector<1x64xf32> -> vector<1x64xf32>
    %c0_25 = arith.constant 0 : index
    %c0_26 = arith.constant 0 : index
    %34 = vector.load %arg8[%c0_25, %c0_26] : memref<1x64xf32, #tpu.memory_space<vmem>>, vector<1x64xf32>
    %35 = arith.addf %33, %34 : vector<1x64xf32>
    %cst_27 = arith.constant 0.000000e+00 : f32
    %36 = vector.broadcast %cst_27 : f32 to vector<1x64xf32>
    %37 = arith.maximumf %35, %36 : vector<1x64xf32>
    %38 = arith.truncf %37 : vector<1x64xf32> to vector<1x64xbf16>
    %c0_28 = arith.constant 0 : index
    %c0_29 = arith.constant 0 : index
    %39 = vector.load %arg9[%c0_28, %c0_29] : memref<64x128xbf16, #tpu.memory_space<vmem>>, vector<64x128xbf16>
    %cst_30 = arith.constant dense<0.000000e+00> : vector<1x128xf32>
    %40 = tpu.matmul %38, %39, %cst_30 {dimension_numbers = #tpu.dot_dimension_numbers<[1], [0], [0], [1], [0, 0, 1, 1], [], []>} : vector<1x64xbf16>, vector<64x128xbf16>, vector<1x128xf32> -> vector<1x128xf32>
    %c0_31 = arith.constant 0 : index
    %c0_32 = arith.constant 0 : index
    %41 = vector.load %arg10[%c0_31, %c0_32] : memref<1x128xf32, #tpu.memory_space<vmem>>, vector<1x128xf32>
    %42 = arith.addf %40, %41 : vector<1x128xf32>
    %c0_33 = arith.constant 0 : index
    %c0_34 = arith.constant 0 : index
    %c0_35 = arith.constant 0 : index
    %43 = vector.load %arg11[%c0_33, %c0_34, %c0_35] : memref<1x1x128xf32, #tpu.memory_space<vmem>>, vector<1x1x128xf32>
    %44 = vector.shape_cast %43 : vector<1x1x128xf32> to vector<1x128xf32>
    %45 = vector.shape_cast %42 : vector<1x128xf32> to vector<1x1x128xf32>
    tpu.vector_store %arg11[%c0_33, %c0_34, %c0_35], %45 {strides = array<i32>} : memref<1x1x128xf32, #tpu.memory_space<vmem>>, vector<1x1x128xf32>,
    return
  }
  func.func @transform_0(%arg0: i32) -> (i32, i32, i32) {
    %c0_i32 = arith.constant 0 : i32
    %c0_i32_0 = arith.constant 0 : i32
    %c0_i32_1 = arith.constant 0 : i32
    %c0_i32_2 = arith.constant 0 : i32
    return %c0_i32, %c0_i32_0, %c0_i32_1 : i32, i32, i32
  }
  func.func @transform_1(%arg0: i32) -> (i32, i32, i32) {
    %c0_i32 = arith.constant 0 : i32
    %c0_i32_0 = arith.constant 0 : i32
    %c0_i32_1 = arith.constant 0 : i32
    return %arg0, %c0_i32, %c0_i32_0 : i32, i32, i32
  }
  func.func @transform_2(%arg0: i32) -> (i32, i32) {
    %c0_i32 = arith.constant 0 : i32
    %c0_i32_0 = arith.constant 0 : i32
    %c0_i32_1 = arith.constant 0 : i32
    return %c0_i32, %c0_i32_0 : i32, i32
  }
  func.func @transform_3(%arg0: i32) -> (i32, i32) {
    %c0_i32 = arith.constant 0 : i32
    %c0_i32_0 = arith.constant 0 : i32
    %c0_i32_1 = arith.constant 0 : i32
    return %c0_i32, %c0_i32_0 : i32, i32
  }
  func.func @transform_4(%arg0: i32) -> (i32, i32) {
    %c0_i32 = arith.constant 0 : i32
    %c0_i32_0 = arith.constant 0 : i32
    %c0_i32_1 = arith.constant 0 : i32
    return %c0_i32, %c0_i32_0 : i32, i32
  }
  func.func @transform_5(%arg0: i32) -> (i32, i32) {
    %c0_i32 = arith.constant 0 : i32
    %c0_i32_0 = arith.constant 0 : i32
    %c0_i32_1 = arith.constant 0 : i32
    return %c0_i32, %c0_i32_0 : i32, i32
  }
  func.func @transform_6(%arg0: i32) -> (i32, i32) {
    %c0_i32 = arith.constant 0 : i32
    %c0_i32_0 = arith.constant 0 : i32
    %c0_i32_1 = arith.constant 0 : i32
    return %c0_i32, %c0_i32_0 : i32, i32
  }
  func.func @transform_7(%arg0: i32) -> (i32, i32) {
    %c0_i32 = arith.constant 0 : i32
    %c0_i32_0 = arith.constant 0 : i32
    %c0_i32_1 = arith.constant 0 : i32
    return %c0_i32, %c0_i32_0 : i32, i32
  }
  func.func @transform_8(%arg0: i32) -> (i32, i32) {
    %c0_i32 = arith.constant 0 : i32
    %c0_i32_0 = arith.constant 0 : i32
    %c0_i32_1 = arith.constant 0 : i32
    return %c0_i32, %c0_i32_0 : i32, i32
  }
  func.func @transform_9(%arg0: i32) -> (i32, i32) {
    %c0_i32 = arith.constant 0 : i32
    %c0_i32_0 = arith.constant 0 : i32
    %c0_i32_1 = arith.constant 0 : i32
    return %c0_i32, %c0_i32_0 : i32, i32
  }
  func.func @transform_10(%arg0: i32) -> (i32, i32, i32) {
    %c0_i32 = arith.constant 0 : i32
    %c0_i32_0 = arith.constant 0 : i32
    %c0_i32_1 = arith.constant 0 : i32
    return %arg0, %c0_i32, %c0_i32_0 : i32, i32, i32
  }
}

</mosaic_0001>

<bundles_post_ra>
// kernel: tpu_custom_call.1
= control target key start
LH: loop header
LB: loop body
LE: loop exit
PB: predicated region body
PF: predicated region fallthrough
CT: control target
= control target key end

     0   :  { %15 = vsyncpa [#allocation3], 0  ;;  %s1396_s0 = inlined_call_operand.vmem [shape: bf16[2,16,16], index: 0, kind: input, shape index: {}]   ;;  %s1397_s1 = inlined_call_operand.vmem [shape: bf16[2,16,4], index: 1, kind: input, shape index: {}]   ;;  %s1398_s2 = inlined_call_operand.vmem [shape: bf16[4,128], index: 2, kind: input, shape index: {}]   ;;  %s1399_s3 = inlined_call_operand.vmem [shape: f32[1,128], index: 3, kind: input, shape index: {}]   ;;  %s1400_s4 = inlined_call_operand.vmem [shape: bf16[128,64], index: 4, kind: input, shape index: {}]   ;;  %s1401_s5 = inlined_call_operand.vmem [shape: f32[1,64], index: 5, kind: input, shape index: {}]   ;;  %s1402_s6 = inlined_call_operand.vmem [shape: bf16[64,64], index: 6, kind: input, shape index: {}]   ;;  %s1403_s7 = inlined_call_operand.vmem [shape: f32[1,64], index: 7, kind: input, shape index: {}]   ;;  %s1404_s8 = inlined_call_operand.vmem [shape: bf16[64,128], index: 8, kind: input, shape index: {}]   ;;  %s1405_s9 = inlined_call_operand.vmem [shape: f32[1,128], index: 9, kind: input, shape index: {}]   ;;  %s1406_s10 = inlined_call_operand.hbm [shape: f32[2,1,128], index: 10, kind: output, shape index: {}]  }
   0x1   :  { %17 = vsyncpa [#allocation3 + $0x1], 0  ;;  %s1183_s13 = smov 0   ;;  %s1185_s14 = smov 0  }
   0x2   :  { %s1187_s15 = smov 0   ;;  %s1189_s16 = smov 0  }
   0x3 LB: > { %s1204_s17 = sadd.s32 4294967295, %s1123_s16   ;;  %s879_s18 = sadd.s32 4294967294, %s1123_s16   ;;  %s1123_s16 = sphi %s1189_s16, %s1412_s16   ;;  %s1119_s15 = sphi %s1187_s15, %s1411_s15   ;;  %s1115_s14 = sphi %s1185_s14, %s1410_s14   ;;  %s1111_s13 = sphi %s1183_s13, %s1409_s13  }
   0x4   : > { %s1208_s19 = sadd.s32 1, %s1123_s16   ;;  %s245_s20 = sadd.s32 1, %s1119_s15 }
   0x5   : > { %s242_s21 = ssub.s32 %s1123_s16, %s1208_s19  ;;  %p255_p0 = scmp.ne.s32.totalorder %s1119_s15, %s1115_s14 }
   0x6   : > { %p243_p1 = scmp.eq.s32.totalorder %s242_s21, 0  ;;  %p256_p2 = scmp.eq.s32.totalorder %s1204_s17, 1 }
   0x7   : > { %p261_p3 = scmp.ne.s32.totalorder %s1115_s14, %s1111_s13  ;;  %p262_p4 = scmp.eq.s32.totalorder %s879_s18, 1 }
   0x8   : > { %s1219_s22 = scalar_select %p243_p1, %s1119_s15, %s245_s20  }
   0x9   : > { %p1221_p5 = por %p256_p2, %p255_p0  ;;  %p1225_p6 = por %p262_p4, %p261_p3 }
   0xa   : > { %p882_p7 = scmp.ge.s32.totalorder %s1123_s16, 1  ;;  %p315_p8 = scmp.lt.s32.totalorder %s1123_s16, 3 }
   0xc   : > { %p316_p9 = pnand %p882_p7, %p315_p8 }
   0xd   : > { %v371_v0 = vld [vmem:[%s1398_s2] sm:$0x3] (!%p316_p9)  ;;  %vm381_vm0 = vcmask (!%p316_p9), 1041408   ;;  %p352_p10 = scmp.lt.s32.totalorder (!%p316_p9), %s1204_s17, 1  ;;  %v1125_v1 = vmov (!%p316_p9), 0.0   ;;  %vm1126_vm1 = vmmov (!%p316_p9), 0  }
   0xe   : > { %319 = sbr.rel (%p316_p9) target bundleno = 1367 (0x557), region = 60  ;;  %941 = vmatprep.subr.bf16.mxu0 (!%p316_p9), %v1125_v1  ;;  %v383_v2 = vsel (!%p316_p9), %vm381_vm0, %v371_v0, 0  ;;  %943 = vmatprep.mubr.msk.bf16.mxu0 (!%p316_p9), %vm1126_vm1, %v1125_v1  ;;  %vm377_vm2 = vcmask (!%p316_p9), 31744   ;;  %v1045_v4 = vld [vmem:[%s1400_s4] sm:$0xff] (!%p316_p9)   ;;  %v1046_v5 = vld [vmem:[%s1400_s4 + $0x8] sm:$0xff] (!%p316_p9)   ;;  %v1047_v6 = vld [vmem:[%s1400_s4 + $0x10] sm:$0xff] (!%p316_p9)  }
   0xf   : > { %942 = vmatpush3.bf16.msra.mxu0 (!%p316_p9), %v383_v2  ;;  %947 = vmatprep.subr.bf16.mxu1 (!%p316_p9), %v1125_v1  ;;  %v1048_v7 = vld [vmem:[%s1400_s4 + $0x18] sm:$0xff] (!%p316_p9)   ;;  %v1049_v8 = vld [vmem:[%s1400_s4 + $0x20] sm:$0xff] (!%p316_p9)   ;;  %v1050_v9 = vld [vmem:[%s1400_s4 + $0x28] sm:$0xff] (!%p316_p9)   ;;  %p358_p11 = scmp.eq.s32.totalorder (!%p316_p9), %s1204_s17, 0  ;;  %vm439_vm4 = vcmask (!%p316_p9), 130048   ;;  %vm643_vm5 = vcmask (!%p316_p9), 523264  }
  0x10   : > { %949 = vmatprep.mubr.msk.bf16.mxu1 (!%p316_p9), %vm1126_vm1, %v1125_v1  ;;  %953 = vmatprep.subr.bf16.mxu0 (!%p316_p9), %v1125_v1  ;;  %v359_v11 = vld [vmem:[%s1396_s0] sm:$0xf] (!%p316_p9)  ;;  %v360_v12 = vld [vmem:[%s1396_s0 + $0x4] sm:$0xf] (!%p316_p9)  ;;  %v885_v13 = vld [vmem:[%s1396_s0 + $0x8] sm:$0xf] (!%p316_p9) }
  0x11   : > { %v886_v14 = vld [vmem:[%s1396_s0 + $0xc] sm:$0xf] (!%p316_p9)  ;;  %v1051_v23 = vld [vmem:[%s1400_s4 + $0x30] sm:$0xff] (!%p316_p9)   ;;  %v1052_v24 = vld [vmem:[%s1400_s4 + $0x38] sm:$0xff] (!%p316_p9)   ;;  %s350_s21 = sand.u32 (!%p316_p9), 1, %s1115_s14   ;;  %s1127_s20 = smov (!%p316_p9), [#allocation2]  }
  0x12   : > { %v889_v25 = vld [vmem:[%s1399_s3] ss:$0 sm:$0xff] (!%p316_p9)  ;;  %v1054_v41 = vld [vmem:[%s1402_s6 + $0x8] sm:$0xff] (!%p316_p9)   ;;  %v1055_v42 = vld [vmem:[%s1402_s6 + $0x10] sm:$0xff] (!%p316_p9)   ;;  %s1065_s25 = sshll.u32 (!%p316_p9), %s1127_s20, 4  ;;  %s1066_s25 = int_to_ptr.vmem [resolvable:$false] %s1065_s25 }
  0x13   : > { %v1053_v40 = vld [vmem:[%s1402_s6] sm:$0xff] (!%p316_p9)   ;;  %v1056_v43 = vld [vmem:[%s1402_s6 + $0x18] sm:$0xff] (!%p316_p9)   ;;  %v1058_v2 = vld [vmem:[%s1404_s8 + $0x8] sm:$0xff] (!%p316_p9)   ;;  %s1067_s26 = scalar_lea.vmem (!%p316_p9), %s1066_s25, 32 }
  0x14   : > { %v900_v44 = vld [vmem:[%s1401_s5] ss:$0 sm:$0xff] (!%p316_p9) }
  0x15   : > { %s353_s27 = scalar_select %p352_p10, %s1204_s17, 1  ;;  %v1057_v63 = vld [vmem:[%s1404_s8] sm:$0xff]  }
  0x16   : > { %s364_s18 = scalar_select %p358_p11, 1, 0 }
  0x17   : > { %s915_s28 = sshll.u32 %s353_s27, 3  ;;  %s912_s27 = sshll.u32 %s1204_s17, 4 }
  0x18   : > { %s356_s11 = scalar_lea.vmem %s1397_s1, %s915_s28  ;;  %v365_v10 = vstv %s364_s18  ;;  %s351_s28 = scalar_lea.vmem [#allocation2], %s350_s21 }
  0x19   : > { %v1044_v3 = vld [vmem:[%s356_s11] sm:$0xff]   ;;  %vm366_vm3 = vcmp.eq.s32.totalorder %v365_v10, 1  ;;  %s824_s29 = sshll.u32 %s351_s28, 4  ;;  %s1354_s12 = scalar_lea.hbm %s1406_s10, %s912_s27  ;;  %s1356_s29 = int_to_ptr.vmem [resolvable:$true] %s824_s29 }
  0x1a   : > { %944 = vmatmul.mubr.msk.bf16.vlgmr.msra.gmra.mrb[0].mxu0 %vm377_vm2, %v1044_v3  ;;  %v367_v17 = vsel %vm366_vm3, %v359_v11, %v885_v13  ;;  %v368_v18 = vsel %vm366_vm3, %v360_v12, %v886_v14  ;;  %v1059_v3 = vld [vmem:[%s1404_s8 + $0x10] sm:$0xff]   ;;  %s812_s18 = scalar_lea.sflag [#allocation3], %s350_s21  ;;  %s1061_s17 = scalar_lea.vmem %s1356_s29, 16 }
  0x1b   : > { %969 = vmatprep.mubr.msk.bf16.mxu0 %vm1126_vm1, %v1125_v1  ;;  %954 = vmatpush3.bf16.msra.mxu0 %v1045_v4  ;;  %v890_v22 = vcombine.low %v367_v17, %v368_v18  ;;  %v1060_v4 = vld [vmem:[%s1404_s8 + $0x18] sm:$0xff]   ;;  %p1062_p12 = scmp.ne.s32.totalorder %s1356_s29, %s1061_s17  ;;  %p1068_p1 = scmp.lt.s32.totalorder %s1356_s29, %s1066_s25 }
  0x1c   : > { %955 = vmatprep.subr.bf16.mxu0 %v1125_v1  ;;  %p1069_p2 = scmp.lt.s32.totalorder %s1067_s26, %s1061_s17 }
  0x1d   : > { %p1063_p13 = pnand %p1062_p12, %p1221_p5 }
  0x1e   : > { %p1070_p3 = por %p1069_p2, %p1068_p1 }
  0x1f   : > { %956 = vmatpush3.bf16.msra.mxu0 %v1046_v5  ;;  %v664_v5 = vld [vmem:[%s1403_s7] sm:$0x1]  ;;  %p1064_p0 = pneg %p1063_p13 }
  0x20   : > { %957 = vmatprep.subr.bf16.mxu0 %v1125_v1 }
  0x21   : > { %p1071_p4 = pnand %p1070_p3, %p1064_p0 }
  0x23   : > { %958 = vmatpush3.bf16.msra.mxu0 %v1047_v6 }
  0x24   : > { %959 = vmatprep.subr.bf16.mxu0 %v1125_v1 }
  0x27   : > { %960 = vmatpush3.bf16.msra.mxu0 %v1048_v7 }
  0x28   : > { %961 = vmatprep.subr.bf16.mxu0 %v1125_v1 }
  0x2b   : > { %962 = vmatpush3.bf16.msra.mxu0 %v1049_v8 }
  0x2c   : > { %963 = vmatprep.subr.bf16.mxu0 %v1125_v1 }
  0x2f   : > { %964 = vmatpush3.bf16.msra.mxu0 %v1050_v9 }
  0x30   : > { %965 = vmatprep.subr.bf16.mxu0 %v1125_v1 }
  0x33   : > { %966 = vmatpush3.bf16.msra.mxu0 %v1051_v23 }
  0x34   : > { %967 = vmatprep.subr.bf16.mxu0 %v1125_v1 }
  0x37   : > { %968 = vmatpush3.bf16.msra.mxu0 %v1052_v24 }
  0xed   : > { %v419_v15 = vpop.f32.mrb[0].mxu0 }
  0xee   : > { %v945_v16 = vpop.f32.mrb[1].mxu0 }
  0xef   : > { %v422_v19 = vpop.f32.mrb[2].mxu0 }
  0xf0   : > { %v426_v20 = vpack.c.bf16 %v422_v19, %v419_v15  ;;  %v946_v21 = vpop.f32.mrb[3].mxu0 }
  0xf2   : > { %948 = vmatpush3.bf16.msra.mxu1 %v426_v20 }
  0xf3   : > { %973 = vmatprep.subr.bf16.mxu1 %v1125_v1 }
  0xf5   : > { %950 = vmatmul.mubr.msk.bf16.vlgmr.msra.gmra.mrb[0].mxu1 %vm439_vm4, %v890_v22 }
  0xf6   : > { %975 = vmatprep.mubr.msk.bf16.mxu1 %vm1126_vm1, %v1125_v1 }
 0x1c8   : > { %v477_v26 = vpop.f32.mrb[0].mxu1 }
 0x1c9   : > { %v478_v27 = vadd.f32 %v889_v25, %v477_v26  ;;  %v951_v28 = vpop.f32.mrb[1].mxu1 }
 0x1ca   : > { %v480_v29 = vpop.f32.mrb[2].mxu1 }
 0x1cb   : > { %v481_v30 = vadd.f32 %v889_v25, %v480_v29  ;;  %v952_v31 = vpop.f32.mrb[3].mxu1  ;;  %v484_v32 = vmax.f32 %v478_v27, 0.0 }
 0x1cd   : > { %v485_v33 = vmax.f32 %v481_v30, 0.0 }
 0x1cf   : > { %v486_v34 = vpack.c.bf16 %v485_v33, %v484_v32 }
 0x1d1   : > { %970 = vmatmul.mubr.bf16.vlgmr.msra.gmra.mrb[4].mxu0 %v486_v34 }
 0x2a4   : > { %v585_v35 = vpop.f32.mrb[4].mxu0 }
 0x2a5   : > { %v971_v36 = vpop.f32.mrb[5].mxu0 }
 0x2a6   : > { %v588_v37 = vpop.f32.mrb[6].mxu0 }
 0x2a7   : > { %v592_v38 = vpack.c.bf16 %v588_v37, %v585_v35  ;;  %v972_v39 = vpop.f32.mrb[7].mxu0 }
 0x2a9   : > { %974 = vmatpush3.bf16.msra.mxu1 %v592_v38 }
 0x2aa   : > { %979 = vmatprep.subr.bf16.mxu1 %v1125_v1 }
 0x2ac   : > { %976 = vmatmul.mubr.msk.bf16.vlgmr.msra.gmra.mrb[4].mxu1 %vm439_vm4, %v890_v22 }
 0x2ad   : > { %987 = vmatprep.mubr.msk.bf16.mxu1 %vm1126_vm1, %v1125_v1  ;;  %980 = vmatpush3.bf16.msra.mxu1 %v1053_v40 }
 0x2ae   : > { %981 = vmatprep.subr.bf16.mxu1 %v1125_v1 }
 0x2b1   : > { %982 = vmatpush3.bf16.msra.mxu1 %v1054_v41 }
 0x2b2   : > { %983 = vmatprep.subr.bf16.mxu1 %v1125_v1 }
 0x2b5   : > { %984 = vmatpush3.bf16.msra.mxu1 %v1055_v42 }
 0x2b6   : > { %985 = vmatprep.subr.bf16.mxu1 %v1125_v1 }
 0x2b9   : > { %986 = vmatpush3.bf16.msra.mxu1 %v1056_v43 }
 0x2ba   : > { %991 = vmatprep.subr.bf16.mxu1 %v1125_v1 }
 0x37f   : > { %v634_v45 = vpop.f32.mrb[4].mxu1 }
 0x380   : > { %v635_v46 = vadd.f32 %v900_v44, %v634_v45  ;;  %v977_v47 = vpop.f32.mrb[5].mxu1 }
 0x381   : > { %v637_v48 = vpop.f32.mrb[6].mxu1 }
 0x382   : > { %v641_v49 = vmax.f32 %v635_v46, 0.0  ;;  %v638_v50 = vadd.f32 %v900_v44, %v637_v48  ;;  %v978_v51 = vpop.f32.mrb[7].mxu1 }
 0x384   : > { %v642_v52 = vmax.f32 %v638_v50, 0.0  ;;  %v644_v53 = vsel %vm643_vm5, %v641_v49, 0.0 }
 0x386   : > { %v645_v54 = vsel %vm643_vm5, %v642_v52, 0.0 }
 0x387   : > { %v646_v55 = vadd.f32 %v645_v54, %v644_v53 }
 0x389   : > { %v647_v56 = vrot.slane %v646_v55, 4 }
 0x38b   : > { %v648_v57 = vadd.f32 %v647_v56, %v646_v55 }
 0x38d   : > { %v649_v58 = vrot.slane %v648_v57, 2 }
 0x38f   : > { %v650_v59 = vadd.f32 %v649_v58, %v648_v57 }
 0x391   : > { %v651_v60 = vrot.slane %v650_v59, 1 }
 0x393   : > { %v652_v61 = vadd.f32 %v651_v60, %v650_v59 }
 0x395   : > { %v654_v62 = vmul.f32 0.0625, %v652_v61 }
 0x397   : > { %v655_v0 = vpack.c.bf16 %v654_v62, %v654_v62 }
 0x399   : > { %988 = vmatmul.mubr.msk.bf16.vlgmr.msra.gmra.mrb[8].mxu1 %vm643_vm5, %v655_v0 }
 0x39a   : > { %992 = vmatpush3.bf16.msra.mxu1 %v1057_v63  ;;  %999 = vmatprep.mubr.msk.bf16.mxu1 %vm1126_vm1, %v1125_v1 }
 0x39b   : > { %993 = vmatprep.subr.bf16.mxu1 %v1125_v1 }
 0x39e   : > { %994 = vmatpush3.bf16.msra.mxu1 %v1058_v2 }
 0x39f   : > { %995 = vmatprep.subr.bf16.mxu1 %v1125_v1 }
 0x3a2   : > { %996 = vmatpush3.bf16.msra.mxu1 %v1059_v3 }
 0x3a3   : > { %997 = vmatprep.subr.bf16.mxu1 %v1125_v1  ;;  %v742_v1 = vld [vmem:[%s1405_s9] sm:$0x1] }
 0x3a6   : > { %998 = vmatpush3.bf16.msra.mxu1 %v1060_v4 }
 0x46c   : > { %v726_v6 = vpop.f32.mrb[8].mxu1 }
 0x46d   : > { %v727_v7 = vadd.f32 %v726_v6, %v664_v5  ;;  %v989_v8 = vpop.f32.mrb[9].mxu1 }
 0x46e   : > { %v729_v9 = vpop.f32.mrb[10].mxu1 }
 0x46f   : > { %v732_v10 = vmax.f32 %v727_v7, 0.0  ;;  %v990_v11 = vpop.f32.mrb[11].mxu1 }
 0x471   : > { %v733_v12 = vpack.c.bf16 %v732_v10, %v732_v10 }
 0x473   : > { %1000 = vmatmul.mubr.msk.bf16.vlgmr.msra.gmra.mrb[12].mxu1 %vm643_vm5, %v733_v12 }
 0x546   : > { %v804_v13 = vpop.f32.mrb[12].mxu1 }
 0x547   : > { %v805_v14 = vadd.f32 %v804_v13, %v742_v1  ;;  %v1001_v15 = vpop.f32.mrb[13].mxu1 }
 0x548   : > { %v807_v16 = vpop.f32.mrb[14].mxu1 }
 0x549   : > { %810 = vst [vmem:[%s351_s28] sm:$0x1] %v805_v14  ;;  %v1002_v17 = vpop.f32.mrb[15].mxu1 }
 0x54a   : > { %1074 = shalt.err (!%p1071_p4)
}
 0x54b   : > { %s1075_s21 = scalar_lea.hbm %s1354_s12, 16  ;;  %s1079_s30 = scalar_lea.hbm %s1406_s10, 32 }
 0x54c   : > { %p1076_p7 = scmp.ne.s32.totalorder %s1354_s12, %s1075_s21  ;;  %p1080_p10 = scmp.lt.u32.totalorder %s1354_s12, %s1406_s10 }
 0x54d   : > { %p1081_p11 = scmp.lt.u32.totalorder %s1079_s30, %s1075_s21  ;;  %p1083_p13 = scmp.lt.u32.totalorder %s1075_s21, %s1354_s12 }
 0x54e   : > { %p1077_p8 = pnand %p1076_p7, %p1221_p5 }
 0x54f   : > { %p1082_p12 = por %p1081_p11, %p1080_p10 }
 0x550   : > { %p1078_p9 = pneg %p1077_p8 }
 0x551   : > { %p1084_p0 = por %p1083_p13, %p1082_p12 }
 0x553   : > { %p1085_p1 = pnand %p1084_p0, %p1078_p9 }
 0x555   : > { %1088 = shalt.err (!%p1085_p1)
}
 0x556   : > { %1003 = dma.vmem_to_hbm [thread:$0]  (%p1221_p5), %s1356_s29, 16, %s1354_s12, %s812_s18  }
 0x557 PF: > { %p1009_p2 = scmp.ge.s32.totalorder %s1123_s16, 2  ;;  %s836_s17 = sand.u32 1, %s1111_s13  }
 0x558   : > { %s837_s25 = scalar_lea.sflag [#allocation3], %s836_s17 }
 0x559   : > { %p1006_p3 = pnand %p1009_p2, %p1225_p6 }
 0x55b   : > { %1106 = dma.done.wait (!%p1006_p3), %s837_s25, 16  }
 0x55c   : > { %1108 = vsyncadd (!%p1006_p3), %s837_s25, 4294967280  ;;  %p20_p4 = scmp.ge.s32.totalorder %s1208_s19, 4   ;;  %s1409_s13 = smov %s1115_s14 }
 0x55d   : > { %s1410_s14 = smov %s1119_s15  ;;  %s1411_s15 = smov %s1219_s22 }
 0x55e   : > { %s1412_s16 = smov %s1208_s19  ;;  %22 = sbr.rel (!%p20_p4) target bundleno = 3 (0x3), region = 96 }
 0x565   :  { %841 = vsyncpa [#allocation3], 1 }
 0x566   :  { %843 = vsyncpa [#allocation3 + $0x1], 1 }

</bundles_post_ra>
